<compile_context>
chip_gen: v7x
topology: tpu7x:2x2x1
jax: 0.10.0
libtpu: 0.0.40
codegen_flags: <defaults>
</compile_context>

<pallas_src>
import functools

import jax
import jax.numpy as jnp
from jax.experimental import pallas as pl
from jax.experimental.pallas import tpu as pltpu


def _round_up(x, m):
    return (x + m - 1) // m * m


def _device_kind():
    try:
        return jax.devices()[0].device_kind.lower()
    except Exception:  # pragma: no cover - defensive
        return ""


def _has_bf16_valu():
    # v2-v5 VPUs have no native bf16 ALU -> do the per-tile max in f32 there.
    k = _device_kind()
    return not any(t in k for t in ("v2", "v3", "v4", "v5"))


def _num_tensorcores():
    k = _device_kind()
    return 2 if ("v7" in k or "tpu7" in k or "7x" in k) else 1


def _vmem_limit(bytes_needed):
    return int(min(max(bytes_needed, 32 << 20), 56 << 20))


_BIG_NEG = float(jnp.finfo(jnp.bfloat16).min)   # finite sentinel: never wins a max,
                                                # and (unlike -inf) is safe inside a matmul.


# --------------------------------------------------------------------------------------
# Fused path: in-kernel embedding gather via one-hot MXU matmul (table resident in VMEM)
# --------------------------------------------------------------------------------------
def _swem_fused_kernel(ids_ref, tab_ref, w_ref, b_ref, o_ref, acc_ref):
    # ids_ref: (TS, TB)       int32 token ids for this (seq, batch) tile
    # tab_ref: (D_pad, V_pad) bf16 transposed embedding table (resident, fetched once)
    # w_ref:   (D_pad, 1)     f32 fc weight column
    # b_ref:   (1,)           f32 fc bias (SMEM)
    # o_ref:   (1, TB)        f32 logits row for this batch tile (lane-dense output)
    # acc_ref: (D_pad, TB)    f32 running max accumulator
    si = pl.program_id(1)
    TS, TB = ids_ref.shape
    V_pad = tab_ref.shape[1]

    @pl.when(si == 0)
    def _init():
        acc_ref[...] = jnp.full_like(acc_ref, _BIG_NEG)

    iota_v = jax.lax.broadcasted_iota(jnp.int32, (V_pad, TB), 0)

    def body(s, carry):
        ids_row = ids_ref[pl.ds(s, 1), :]                            # (1, TB) int32
        onehot = (iota_v == ids_row).astype(jnp.bfloat16)            # (V_pad, TB)
        # Gather-by-matmul on the otherwise idle MXU: exact selection of table rows.
        emb = jnp.dot(tab_ref[...], onehot,
                      preferred_element_type=jnp.float32)            # (D_pad, TB) f32
        acc_ref[...] = jnp.maximum(acc_ref[...], emb)
        return carry

    jax.lax.fori_loop(0, TS, body, 0)

    @pl.when(si == pl.num_programs(1) - 1)
    def _finalize():
        pooled = acc_ref[...]                                        # (D_pad, TB)
        # Linear(D, 1): exact f32 VPU multiply + sublane reduce, once per batch tile.
        logits = jnp.sum(pooled * w_ref[...], axis=0, keepdims=True)  # (1, TB)
        o_ref[...] = logits + b_ref[0]
        # TODO(synk): dropout is identity in eval mode; training-mode dropout not implemented.


def _forward_fused(text, emb_table, fc_w, fc_b, *, batch_tile, seq_tile):
    S, B = text.shape
    V, D = emb_table.shape
    f32 = jnp.float32

    D_pad = _round_up(D, 128)
    V_pad = _round_up(V + 1, 128)          # +1 guarantees a free sentinel column at index V
    TB = _round_up(batch_tile, 128) if batch_tile else 128
    B_pad = _round_up(B, TB)
    if seq_tile is None:
        seq_tile = 512                     # ids are tiny; amortize per-grid-step overhead
    TS = _round_up(max(8, min(seq_tile, S)), 8)
    S_pad = _round_up(S, TS)

    # Transposed table (D_pad, V_pad): real block, zero rows for padded D channels,
    # BIG_NEG columns for padded vocab entries (selected only by padded seq positions,
    # so they can never win the max; finite so 0 * BIG_NEG stays 0 inside the matmul).
    tab_t = jnp.full((D_pad, V_pad), _BIG_NEG, dtype=jnp.bfloat16)
    tab_t = tab_t.at[:, :V].set(
        jnp.pad(emb_table.astype(jnp.bfloat16).T, ((0, D_pad - D), (0, 0))))

    w_t = jnp.pad(fc_w.astype(f32).reshape(D, 1), ((0, D_pad - D), (0, 0)))   # (D_pad, 1)
    b_p = fc_b.astype(f32).reshape((1,))

    # Padded seq positions (and padded batch columns) point at the sentinel column.
    ids = jnp.pad(text.astype(jnp.int32),
                  ((0, S_pad - S), (0, B_pad - B)), constant_values=V)

    grid = (B_pad // TB, S_pad // TS)       # seq (reduction) axis last

    needed = (D_pad * V_pad * 2 + 2 * TS * TB * 4 + D_pad * TB * 4
              + D_pad * 4 + TB * 4 + (2 << 20))

    out = pl.pallas_call(
        _swem_fused_kernel,
        out_shape=jax.ShapeDtypeStruct((1, B_pad), f32),
        grid=grid,
        in_specs=[
            pl.BlockSpec((TS, TB), lambda bi, si: (si, bi)),         # token ids
            pl.BlockSpec((D_pad, V_pad), lambda bi, si: (0, 0)),     # table (resident)
            pl.BlockSpec((D_pad, 1), lambda bi, si: (0, 0)),         # fc weight column
            pl.BlockSpec(memory_space=pltpu.MemorySpace.SMEM),       # fc bias
        ],
        out_specs=pl.BlockSpec((1, TB), lambda bi, si: (0, bi)),
        scratch_shapes=[pltpu.VMEM((D_pad, TB), f32)],
        compiler_params=pltpu.CompilerParams(
            dimension_semantics=("parallel", "arbitrary"),
            vmem_limit_bytes=_vmem_limit(needed),
        ),
    )(ids, tab_t, w_t, b_p)
    return out[0, :B].reshape(B, 1)


# --------------------------------------------------------------------------------------
# Streaming path: XLA bf16 gather + HBM-streaming max reduction (large vocab fallback)
# --------------------------------------------------------------------------------------
def _swem_stream_kernel(emb_ref, w_ref, b_ref, o_ref, acc_ref, *, reduce_in_bf16):
    # emb_ref: (TS, TB, D_pad) bf16 embedded tokens for this (seq, batch) tile
    # w_ref:   (1, D_pad)      f32 fc weight (resident)
    # b_ref:   (1,)            f32 fc bias (SMEM)
    # o_ref:   (TB, 1)         f32 logits for this batch tile
    # acc_ref: (TB, D_pad)     f32 running max accumulator
    si = pl.program_id(1)

    @pl.when(si == 0)
    def _init():
        acc_ref[...] = jnp.full_like(acc_ref, -jnp.inf)

    blk = emb_ref[...]                                   # (TS, TB, D_pad) bf16
    if reduce_in_bf16:
        # bf16 VPU max over the (major) seq axis; upcast only the (TB, D) partial.
        red = jnp.max(blk, axis=0).astype(jnp.float32)
    else:
        # v5e and older: no bf16 VALU -> upcast first.
        red = jnp.max(blk.astype(jnp.float32), axis=0)
    acc_ref[...] = jnp.maximum(acc_ref[...], red)

    @pl.when(si == pl.num_programs(1) - 1)
    def _finalize():
        pooled = acc_ref[...]                            # (TB, D_pad)
        o_ref[...] = jnp.sum(pooled * w_ref[...], axis=-1, keepdims=True) + b_ref[0]
        # TODO(synk): dropout is identity in eval mode; training-mode dropout not implemented.


def _forward_stream(text, emb_table, fc_w, fc_b, *, batch_tile, seq_tile, reduce_in_bf16):
    S, B = text.shape
    V, D = emb_table.shape
    f32 = jnp.float32
    D_pad = _round_up(D, 128)

    if reduce_in_bf16 is None:
        reduce_in_bf16 = _has_bf16_valu()

    # Batch tile: multiple of 16 (dense bf16 sublane packing); >=2 tiles on v7x so both
    # TensorCores get work on the "parallel" batch axis.
    if batch_tile is None:
        batch_tile = 128
    TB = _round_up(min(batch_tile, _round_up(B, 16)), 16)
    B_pad = _round_up(B, TB)
    if _num_tensorcores() >= 2:
        while B_pad // TB < 2 and TB > 16:
            TB = _round_up(TB // 2, 16)
            B_pad = _round_up(B, TB)

    if seq_tile is None:
        # ~8 MiB of bf16 per streamed input tile: amortizes ~0.35us/grid-step overhead
        # and rides the HBM roofline on v6e/v7x (fits v7x's 64 MiB VMEM double-buffered).
        seq_tile = max(1, (8 * 1024 * 1024) // (TB * D_pad * 2))
    TS = max(1, min(seq_tile, S))
    S_pad = _round_up(S, TS)

    emb_p = jnp.pad(emb_table.astype(jnp.bfloat16), ((0, 0), (0, D_pad - D)))
    w_p = jnp.pad(fc_w.astype(f32).reshape(1, D), ((0, 0), (0, D_pad - D)))
    b_p = fc_b.astype(f32).reshape((1,))

    # Gather in XLA, already (S, B, D) layout and bf16 (no transpose, no f32 activations).
    text_p = text.astype(jnp.int32)
    if B_pad > B:
        text_p = jnp.pad(text_p, ((0, 0), (0, B_pad - B)))   # extra columns -> discarded
    if S_pad > S:
        # Padded seq positions gather a -inf sentinel row so they never win the max.
        gather_tab = jnp.concatenate(
            [emb_p, jnp.full((1, D_pad), -jnp.inf, emb_p.dtype)], axis=0)
        text_p = jnp.pad(text_p, ((0, S_pad - S), (0, 0)), constant_values=V)
    else:
        gather_tab = emb_p
    embedded = gather_tab[text_p]                         # (S_pad, B_pad, D_pad) bf16

    grid = (B_pad // TB, S_pad // TS)                     # seq (reduction) axis last
    in_tile = TS * TB * D_pad * 2
    needed = 2 * in_tile + TB * D_pad * 4 + D_pad * 4 + (2 << 20)

    kernel = functools.partial(_swem_stream_kernel, reduce_in_bf16=reduce_in_bf16)
    out = pl.pallas_call(
        kernel,
        out_shape=jax.ShapeDtypeStruct((B_pad, 1), f32),
        grid=grid,
        in_specs=[
            pl.BlockSpec((TS, TB, D_pad), lambda bi, si: (si, bi, 0)),
            pl.BlockSpec((1, D_pad), lambda bi, si: (0, 0)),          # fc weight
            pl.BlockSpec(memory_space=pltpu.MemorySpace.SMEM),        # fc bias
        ],
        out_specs=pl.BlockSpec((TB, 1), lambda bi, si: (bi, 0)),
        scratch_shapes=[pltpu.VMEM((TB, D_pad), f32)],
        compiler_params=pltpu.CompilerParams(
            dimension_semantics=("parallel", "arbitrary"),
            vmem_limit_bytes=_vmem_limit(needed),
        ),
    )(embedded, w_p, b_p)
    return out[:B]


# --------------------------------------------------------------------------------------
# Public forward
# --------------------------------------------------------------------------------------
def swem_max_forward(text, text_len, emb_table, fc_w, fc_b, *,
                     batch_tile=None, seq_tile=None, fuse_gather=None,
                     reduce_in_bf16=None):
    """text: (S, B) int token ids; emb_table: (V, D); fc_w: (1, D); fc_b: (1,).

    Returns f32 logits of shape (B, 1).
    """
    del text_len  # reference forward max-pools over the full sequence (incl. pad tokens)
    V, _ = emb_table.shape
    if fuse_gather is None:
        # One-hot MXU gather only beats streaming HBM traffic for small vocabularies.
        fuse_gather = V <= 1024
    # TODO(synk): a vectorized in-kernel gather (DMA gather / jnp.take row-gather) would
    # extend the fused path to large vocabularies; until then large-V uses streaming.
    if fuse_gather:
        return _forward_fused(text, emb_table, fc_w, fc_b,
                              batch_tile=batch_tile, seq_tile=seq_tile)
    return _forward_stream(text, emb_table, fc_w, fc_b,
                           batch_tile=batch_tile, seq_tile=seq_tile,
                           reduce_in_bf16=reduce_in_bf16)


if __name__ == "__main__":
    # Small deterministic config. seq_len is NOT a multiple of the seq tile so the
    # sentinel-padding path is exercised in both kernels (4 seq grid steps each).
    vocab_size = 64
    embedding_dim = 32      # padded to 128 lanes inside the wrappers
    pad_idx = 0
    seq_len = 30
    batch = 48              # streaming path with batch_tile=16 -> 3 batch tiles

    key = jax.random.PRNGKey(0)
    k_emb, k_w, k_b, k_tok = jax.random.split(key, 4)

    emb_table = jax.random.normal(k_emb, (vocab_size, embedding_dim), dtype=jnp.float32)
    emb_table = emb_table.at[pad_idx].set(0.0)   # padding_idx row is zero

    fc_w = jax.random.normal(k_w, (1, embedding_dim), dtype=jnp.float32) * 0.1
    fc_b = jax.random.normal(k_b, (1,), dtype=jnp.float32) * 0.1

    text = jax.random.randint(k_tok, (seq_len, batch), 0, vocab_size, dtype=jnp.int32)
    text_len = jnp.full((batch,), seq_len, dtype=jnp.int32)

    # Pure-JAX reference with the same bf16 rounding of the embeddings as both paths.
    emb_rounded = emb_table.astype(jnp.bfloat16).astype(jnp.float32)
    pooled_ref = jnp.max(emb_rounded[text], axis=0)                     # (B, D)
    ref = jnp.sum(pooled_ref * fc_w, axis=-1, keepdims=True) + fc_b     # (B, 1)

    # Fused (in-kernel gather) path.
    out_fused = swem_max_forward(text, text_len, emb_table, fc_w, fc_b,
                                 seq_tile=8, fuse_gather=True)
    out_fused = jax.block_until_ready(out_fused)
    assert out_fused.shape == (batch, 1)
    assert jnp.allclose(out_fused, ref, atol=1e-5), "fused path mismatch vs reference"

    # Streaming (large-vocab fallback) path.
    out_stream = swem_max_forward(text, text_len, emb_table, fc_w, fc_b,
                                  batch_tile=16, seq_tile=8, fuse_gather=False)
    out_stream = jax.block_until_ready(out_stream)
    assert out_stream.shape == (batch, 1)
    assert jnp.allclose(out_stream, ref, atol=1e-5), "streaming path mismatch vs reference"

    print("KERNEL_OK")
</pallas_src>

<mosaic_0001>
module attributes {stable_mosaic.version = 11 : i64} {
  func.func @_swem_fused_kernel(%arg0: i32, %arg1: i32, %arg2: memref<8x128xi32, #tpu.memory_space<vmem>>, %arg3: memref<128x128xbf16, #tpu.memory_space<vmem>>, %arg4: memref<128x1xf32, #tpu.memory_space<vmem>>, %arg5: memref<1xf32, #tpu.memory_space<smem>>, %arg6: memref<1x128xf32, #tpu.memory_space<vmem>>, %arg7: memref<128x128xf32, #tpu.memory_space<vmem>>) attributes {dimension_semantics = [#tpu.dimension_semantics<parallel>, #tpu.dimension_semantics<arbitrary>], iteration_bounds = array<i64: 1, 4>, scalar_prefetch = 0 : i64, scratch_operands = 1 : i64, tpu.core_type = #tpu.core_type<tc>, window_params = [{transform_indices = @transform_0, window_bounds = array<i64: 8, 128>}, {pipeline_mode = #tpu.pipeline_mode<synchronous>, transform_indices = @transform_1, window_bounds = array<i64: 128, 128>}, {pipeline_mode = #tpu.pipeline_mode<synchronous>, transform_indices = @transform_2, window_bounds = array<i64: 128, 1>}, {transform_indices = @transform_3, window_bounds = array<i64: 1>}, {transform_indices = @transform_4, window_bounds = array<i64: 1, 128>}]} {
    %c0_i32 = arith.constant 0 : i32
    %0 = arith.cmpi eq, %arg1, %c0_i32 : i32
    %1 = arith.extui %0 : i1 to i32
    %c0_i32_0 = arith.constant 0 : i32
    %2 = arith.cmpi ne, %1, %c0_i32_0 : i32
    scf.if %2 {
      %cst = arith.constant -3.38953139E+38 : f32
      %8 = vector.broadcast %cst : f32 to vector<128x128xf32>
      %c0 = arith.constant 0 : index
      %c0_4 = arith.constant 0 : index
      %9 = vector.load %arg7[%c0, %c0_4] : memref<128x128xf32, #tpu.memory_space<vmem>>, vector<128x128xf32>
      tpu.vector_store %arg7[%c0, %c0_4], %8 {strides = array<i32>} : memref<128x128xf32, #tpu.memory_space<vmem>>, vector<128x128xf32>,
    } else {
    }
    %3 = tpu.iota {dimensions = array<i32: 0>} : vector<128x128xi32>
    %c0_i32_1 = arith.constant 0 : i32
    %c8_i32 = arith.constant 8 : i32
    %4 = arith.addi %c0_i32_1, %c8_i32 : i32
    %c1_i32 = arith.constant 1 : i32
    scf.for %arg8 = %c0_i32_1 to %4 step %c1_i32  : i32 {
      %8 = arith.index_cast %arg8 : i32 to index
      %c0 = arith.constant 0 : index
      %9 = vector.load %arg2[%8, %c0] : memref<8x128xi32, #tpu.memory_space<vmem>>, vector<1x128xi32>
      %10 = vector.broadcast %9 : vector<1x128xi32> to vector<128x128xi32>
      %11 = arith.cmpi eq, %3, %10 : vector<128x128xi32>
      %12 = arith.extui %11 : vector<128x128xi1> to vector<128x128xi32>
      %13 = arith.sitofp %12 : vector<128x128xi32> to vector<128x128xf32>
      %14 = arith.truncf %13 : vector<128x128xf32> to vector<128x128xbf16>
      %c0_4 = arith.constant 0 : index
      %c0_5 = arith.constant 0 : index
      %15 = vector.load %arg3[%c0_4, %c0_5] : memref<128x128xbf16, #tpu.memory_space<vmem>>, vector<128x128xbf16>
      %cst = arith.constant dense<0.000000e+00> : vector<128x128xf32>
      %16 = tpu.matmul %15, %14, %cst {dimension_numbers = #tpu.dot_dimension_numbers<[1], [0], [0], [1], [0, 0, 1, 1], [], []>} : vector<128x128xbf16>, vector<128x128xbf16>, vector<128x128xf32> -> vector<128x128xf32>
      %c0_6 = arith.constant 0 : index
      %c0_7 = arith.constant 0 : index
      %17 = vector.load %arg7[%c0_6, %c0_7] : memref<128x128xf32, #tpu.memory_space<vmem>>, vector<128x128xf32>
      %18 = arith.maximumf %17, %16 : vector<128x128xf32>
      %c0_8 = arith.constant 0 : index
      %c0_9 = arith.constant 0 : index
      %19 = vector.load %arg7[%c0_8, %c0_9] : memref<128x128xf32, #tpu.memory_space<vmem>>, vector<128x128xf32>
      tpu.vector_store %arg7[%c0_8, %c0_9], %18 {strides = array<i32>} : memref<128x128xf32, #tpu.memory_space<vmem>>, vector<128x128xf32>,
    }
    %c8_i32_2 = arith.constant 8 : i32
    %c3_i32 = arith.constant 3 : i32
    %5 = arith.cmpi eq, %arg1, %c3_i32 : i32
    %6 = arith.extui %5 : i1 to i32
    %c0_i32_3 = arith.constant 0 : i32
    %7 = arith.cmpi ne, %6, %c0_i32_3 : i32
    scf.if %7 {
      %c0 = arith.constant 0 : index
      %c0_4 = arith.constant 0 : index
      %8 = vector.load %arg7[%c0, %c0_4] : memref<128x128xf32, #tpu.memory_space<vmem>>, vector<128x128xf32>
      %c0_5 = arith.constant 0 : index
      %c0_6 = arith.constant 0 : index
      %9 = vector.load %arg4[%c0_5, %c0_6] : memref<128x1xf32, #tpu.memory_space<vmem>>, vector<128x1xf32>
      %10 = vector.broadcast %9 : vector<128x1xf32> to vector<128x128xf32>
      %11 = arith.mulf %8, %10 : vector<128x128xf32>
      %cst = arith.constant dense<0.000000e+00> : vector<128xf32>
      %12 = vector.multi_reduction <add>, %11, %cst [0] : vector<128x128xf32> to vector<128xf32>
      %13 = vector.shape_cast %12 : vector<128xf32> to vector<1x128xf32>
      %c0_7 = arith.constant 0 : index
      %14 = memref.load %arg5[%c0_7] : memref<1xf32, #tpu.memory_space<smem>>
      %15 = vector.broadcast %14 : f32 to vector<1x128xf32>
      %16 = arith.addf %13, %15 : vector<1x128xf32>
      %c0_8 = arith.constant 0 : index
      %c0_9 = arith.constant 0 : index
      %17 = vector.load %arg6[%c0_8, %c0_9] : memref<1x128xf32, #tpu.memory_space<vmem>>, vector<1x128xf32>
      tpu.vector_store %arg6[%c0_8, %c0_9], %16 {strides = array<i32>} : memref<1x128xf32, #tpu.memory_space<vmem>>, vector<1x128xf32>,
    } else {
    }
    return
  }
  func.func @transform_0(%arg0: i32, %arg1: i32) -> (i32, i32) {
    %c0_i32 = arith.constant 0 : i32
    return %arg1, %arg0 : i32, i32
  }
  func.func @transform_1(%arg0: i32, %arg1: i32) -> (i32, i32) {
    %c0_i32 = arith.constant 0 : i32
    %c0_i32_0 = arith.constant 0 : i32
    %c0_i32_1 = arith.constant 0 : i32
    return %c0_i32, %c0_i32_0 : i32, i32
  }
  func.func @transform_2(%arg0: i32, %arg1: i32) -> (i32, i32) {
    %c0_i32 = arith.constant 0 : i32
    %c0_i32_0 = arith.constant 0 : i32
    %c0_i32_1 = arith.constant 0 : i32
    return %c0_i32, %c0_i32_0 : i32, i32
  }
  func.func @transform_3(%arg0: i32, %arg1: i32) -> i32 {
    %c0_i32 = arith.constant 0 : i32
    %c0_i32_0 = arith.constant 0 : i32
    return %c0_i32 : i32
  }
  func.func @transform_4(%arg0: i32, %arg1: i32) -> (i32, i32) {
    %c0_i32 = arith.constant 0 : i32
    %c0_i32_0 = arith.constant 0 : i32
    return %c0_i32, %arg0 : i32, i32
  }
}

</mosaic_0001>

<bundles_post_ra>
// kernel: tpu_custom_call.1
= control target key start
LH: loop header
LB: loop body
LE: loop exit
PB: predicated region body
PF: predicated region fallthrough
CT: control target
= control target key end

     0   :  { %s1224_s0 = inlined_call_operand.vmem [shape: s32[32,128], index: 0, kind: input, shape index: {}]   ;;  %s1225_s1 = inlined_call_operand.vmem [shape: bf16[128,128], index: 1, kind: input, shape index: {}]   ;;  %s1226_s2 = inlined_call_operand.vmem [shape: f32[128,1], index: 2, kind: input, shape index: {}]   ;;  %s1227_s3 = inlined_call_operand.<no memory space> [shape: f32[1], index: 3, kind: input, shape index: {}]   ;;  %s1228_s4 = inlined_call_operand.hbm [shape: f32[1,128], index: 4, kind: output, shape index: {}]  }
   0x1   :  { %9 = sst [smem:[#allocation3]] %s1227_s3 }
   0x2   :  { %10 = vsyncpa [#allocation5], 0  ;;  %s1012_s17 = smov 0   ;;  %s1014_s18 = smov 0  }
   0x3   :  { %s1016_s19 = smov 0  }
   0x4 LB: > { %s750_s3 = sadd.s32 4294967295, %s974_s19   ;;  %s25_s20 = sadd.s32 1, %s970_s18  ;;  %s974_s19 = sphi %s1016_s19, %s16_s19   ;;  %s970_s18 = sphi %s1014_s18, %s1231_s18   ;;  %s966_s17 = sphi %s1012_s17, %s1230_s17  }
   0x5   : > { %p26_p0 = scmp.ge.s32.totalorder %s25_s20, 4  ;;  %p753_p1 = scmp.ge.s32.totalorder %s974_s19, 1 }
   0x6   : > { %p180_p2 = scmp.lt.s32.totalorder %s974_s19, 5 }
   0x7   : > { %s1233_s20 = smov (%p26_p0, %s25_s20), 0 }
   0x8   : > { %p181_p3 = pnand %p753_p1, %p180_p2 }
   0x9   : > { %p203_p4 = scmp.lt.s32.totalorder (!%p181_p3), %s966_s17, 3  ;;  %p755_p5 = scmp.ne.s32.totalorder (!%p181_p3), %s966_s17, 0 }
   0xa   : > { %184 = sbr.rel (%p181_p3) target bundleno = 504 (0x1f8), region = 36 }
  0x11   : > { %s204_s21 = scalar_select %p203_p4, %s966_s17, 3 }
  0x12   : > { %214 = sbr.rel (%p755_p5) target bundleno = 27 (0x1b), region = 40  ;;  %v980_v0 = vmov (!%p755_p5), -3.3895314e+38  }
  0x13   : > { %s754_s22 = sshll.u32 %s204_s21, 3  ;;  %215 = vst [vmem:[#allocation2] sm:$0xff] (!%p755_p5), %v980_v0  ;;  %216 = vst [vmem:[#allocation2 + $0x8] sm:$0xff] (!%p755_p5), %v980_v0 }
  0x14   : > { %s1038_s25 = scalar_lea.vmem %s1224_s0, %s754_s22  ;;  %217 = vst [vmem:[#allocation2 + $0x10] sm:$0xff] (!%p755_p5), %v980_v0  ;;  %218 = vst [vmem:[#allocation2 + $0x18] sm:$0xff] (!%p755_p5), %v980_v0 }
  0x15   : > { %219 = vst [vmem:[#allocation2 + $0x20] sm:$0xff] (!%p755_p5), %v980_v0  ;;  %220 = vst [vmem:[#allocation2 + $0x28] sm:$0xff] (!%p755_p5), %v980_v0 }
  0x16   : > { %221 = vst [vmem:[#allocation2 + $0x30] sm:$0xff] (!%p755_p5), %v980_v0  ;;  %222 = vst [vmem:[#allocation2 + $0x38] sm:$0xff] (!%p755_p5), %v980_v0 }
  0x17   : > { %223 = vst [vmem:[#allocation2 + $0x40] sm:$0xff] (!%p755_p5), %v980_v0  ;;  %224 = vst [vmem:[#allocation2 + $0x48] sm:$0xff] (!%p755_p5), %v980_v0 }
  0x18   : > { %225 = vst [vmem:[#allocation2 + $0x50] sm:$0xff] (!%p755_p5), %v980_v0  ;;  %226 = vst [vmem:[#allocation2 + $0x58] sm:$0xff] (!%p755_p5), %v980_v0 }
  0x19   : > { %227 = vst [vmem:[#allocation2 + $0x60] sm:$0xff] %v980_v0  ;;  %228 = vst [vmem:[#allocation2 + $0x68] sm:$0xff] %v980_v0 }
  0x1a   : > { %229 = vst [vmem:[#allocation2 + $0x70] sm:$0xff] %v980_v0  ;;  %230 = vst [vmem:[#allocation2 + $0x78] sm:$0xff] %v980_v0 }
  0x1b PF: > { %v231_v1 = vlaneseq  ;;  %s1088_s26 = smov 0  }
  0x1d   : > { %v1041_v2 = vshrl.u32 %v231_v1, 7 }
  0x1f   : > { %v1044_v3 = vadd.s32 8, %v1041_v2  ;;  %v1047_v4 = vadd.s32 16, %v1041_v2  ;;  %v1050_v5 = vadd.s32 24, %v1041_v2  ;;  %v1053_v6 = vadd.s32 32, %v1041_v2 }
  0x20   : > { %v1056_v7 = vadd.s32 40, %v1041_v2  ;;  %v1059_v8 = vadd.s32 48, %v1041_v2  ;;  %v1062_v9 = vadd.s32 56, %v1041_v2  ;;  %v1065_v10 = vadd.s32 64, %v1041_v2 }
  0x21   : > { %v1068_v11 = vadd.s32 72, %v1041_v2  ;;  %v1071_v12 = vadd.s32 80, %v1041_v2  ;;  %v1074_v13 = vadd.s32 88, %v1041_v2  ;;  %v1077_v14 = vadd.s32 96, %v1041_v2 }
  0x22   : > { %v1080_v15 = vadd.s32 104, %v1041_v2  ;;  %v1083_v16 = vadd.s32 112, %v1041_v2  ;;  %v1086_v17 = vadd.s32 120, %v1041_v2 }
  0x23 LB: >> { %v908_v18 = vld [vmem:[%s1225_s1] sm:$0xff]   ;;  %s254_s29 = scalar_lea.vmem %s1038_s25, %s978_s26  ;;  %v981_v21 = vmov 1.0|1.0   ;;  %v910_v22 = vld [vmem:[%s1225_s1 + $0x8] sm:$0xff]   ;;  %v912_v24 = vld [vmem:[%s1225_s1 + $0x10] sm:$0xff]   ;;  %s253_s26 = sadd.s32 1, %s978_s26   ;;  %s978_s26 = sphi %s1088_s26, %s253_s26  }
  0x24   : >> { %v909_v19 = vld [vmem:[%s1225_s1 + $0x20] sm:$0xff]   ;;  %834 = vmatprep.mubr.bf16.mxu0 %v908_v18  ;;  %v911_v23 = vld [vmem:[%s1225_s1 + $0x28] sm:$0xff]   ;;  %v913_v25 = vld [vmem:[%s1225_s1 + $0x30] sm:$0xff]   ;;  %p250_p6 = scmp.ge.s32.totalorder %s253_s26, 8  }
  0x25   : >> { %v756_v20 = vld [vmem:[%s254_s29] ss:$0 sm:$0xff]  ;;  %842 = vmatprep.mubr.bf16.mxu1 %v909_v19  ;;  %v914_v26 = vld [vmem:[%s1225_s1 + $0x18] sm:$0xff]   ;;  %v479_v28 = vld [vmem:[#allocation2 + $0x10] sm:$0xff]  ;;  %p797_p7 = scmp.ne.s32.totalorder (%p250_p6), %s966_s17, 3 }
  0x26   : >> { %vm260_vm0 = vcmp.eq.s32.totalorder %v1041_v2, %v756_v20  ;;  %vm261_vm1 = vcmp.eq.s32.totalorder %v1044_v3, %v756_v20  ;;  %vm262_vm2 = vcmp.eq.s32.totalorder %v1047_v4, %v756_v20  ;;  %vm263_vm3 = vcmp.eq.s32.totalorder %v1050_v5, %v756_v20  ;;  %v915_v27 = vld [vmem:[%s1225_s1 + $0x38] sm:$0xff]   ;;  %v487_v29 = vld [vmem:[#allocation2 + $0x50] sm:$0xff]  ;;  %v477_v30 = vld [vmem:[#allocation2] sm:$0xff] }
  0x27   : >> { %vm781_vm4 = vmpackc.low %vm261_vm1, %vm260_vm0  ;;  %vm264_vm6 = vcmp.eq.s32.totalorder %v1053_v6, %v756_v20  ;;  %vm265_vm7 = vcmp.eq.s32.totalorder %v1056_v7, %v756_v20  ;;  %vm266_vm9 = vcmp.eq.s32.totalorder %v1059_v8, %v756_v20  ;;  %vm267_vm10 = vcmp.eq.s32.totalorder %v1062_v9, %v756_v20  ;;  %v485_v31 = vld [vmem:[#allocation2 + $0x40] sm:$0xff]  ;;  %v480_v34 = vld [vmem:[#allocation2 + $0x18] sm:$0xff] }
  0x28   : >> { %818 = vmatprep.subr.msk.bf16.mxu0 %vm781_vm4, %v981_v21  ;;  %850 = vmatprep.subr.msk.bf16.mxu1 %vm781_vm4, %v981_v21  ;;  %vm783_vm5 = vmpackc.low %vm263_vm3, %vm262_vm2  ;;  %vm268_vm12 = vcmp.eq.s32.totalorder %v1065_v10, %v756_v20  ;;  %vm269_vm13 = vcmp.eq.s32.totalorder %v1068_v11, %v756_v20  ;;  %vm270_vm15 = vcmp.eq.s32.totalorder %v1071_v12, %v756_v20  ;;  %v488_v35 = vld [vmem:[#allocation2 + $0x58] sm:$0xff]  ;;  %v478_v40 = vld [vmem:[#allocation2 + $0x8] sm:$0xff] }
  0x29   : >> { %819 = vmatpush3.bf16.msk.msra.mxu0 %vm781_vm4, %v981_v21  ;;  %858 = vmatpush3.bf16.msk.msra.mxu1 %vm781_vm4, %v981_v21  ;;  %vm785_vm8 = vmpackc.low %vm265_vm7, %vm264_vm6  ;;  %vm271_vm0 = vcmp.eq.s32.totalorder %v1074_v13, %v756_v20  ;;  %vm272_vm2 = vcmp.eq.s32.totalorder %v1077_v14, %v756_v20  ;;  %vm273_vm3 = vcmp.eq.s32.totalorder %v1080_v15, %v756_v20  ;;  %v486_v41 = vld [vmem:[#allocation2 + $0x48] sm:$0xff]  ;;  %v483_v52 = vld [vmem:[#allocation2 + $0x30] sm:$0xff] }
  0x2a   : >> { %820 = vmatprep.subr.msk.bf16.mxu0 %vm783_vm5, %v981_v21  ;;  %851 = vmatprep.subr.msk.bf16.mxu1 %vm783_vm5, %v981_v21  ;;  %vm787_vm11 = vmpackc.low %vm267_vm10, %vm266_vm9  ;;  %vm275_vm6 = vcmp.eq.s32.totalorder %v1086_v17, %v756_v20  ;;  %v491_v53 = vld [vmem:[#allocation2 + $0x70] sm:$0xff]  ;;  %v481_v54 = vld [vmem:[#allocation2 + $0x20] sm:$0xff] }
  0x2b   : >> { %vm789_vm14 = vmpackc.low %vm269_vm13, %vm268_vm12  ;;  %v489_v55 = vld [vmem:[#allocation2 + $0x60] sm:$0xff]  ;;  %v484_v58 = vld [vmem:[#allocation2 + $0x38] sm:$0xff] }
  0x2c   : >> { %vm791_vm1 = vmpackc.low %vm271_vm0, %vm270_vm15  ;;  %v492_v59 = vld [vmem:[#allocation2 + $0x78] sm:$0xff]  ;;  %v482_v0 = vld [vmem:[#allocation2 + $0x28] sm:$0xff] }
  0x2d   : >> { %821 = vmatpush3.bf16.msk.msra.mxu0 %vm783_vm5, %v981_v21  ;;  %859 = vmatpush3.bf16.msk.msra.mxu1 %vm783_vm5, %v981_v21  ;;  %vm793_vm4 = vmpackc.low %vm273_vm3, %vm272_vm2  ;;  %vm274_vm5 = vcmp.eq.s32.totalorder %v1083_v16, %v756_v20  ;;  %v490_v1 = vld [vmem:[#allocation2 + $0x68] sm:$0xff] }
  0x2e   : >> { %822 = vmatprep.subr.msk.bf16.mxu0 %vm785_vm8, %v981_v21  ;;  %852 = vmatprep.subr.msk.bf16.mxu1 %vm785_vm8, %v981_v21  ;;  %vm795_vm7 = vmpackc.low %vm275_vm6, %vm274_vm5 }
  0x31   : >> { %823 = vmatpush3.bf16.msk.msra.mxu0 %vm785_vm8, %v981_v21  ;;  %860 = vmatpush3.bf16.msk.msra.mxu1 %vm785_vm8, %v981_v21 }
  0x32   : >> { %824 = vmatprep.subr.msk.bf16.mxu0 %vm787_vm11, %v981_v21  ;;  %853 = vmatprep.subr.msk.bf16.mxu1 %vm787_vm11, %v981_v21 }
  0x35   : >> { %825 = vmatpush3.bf16.msk.msra.mxu0 %vm787_vm11, %v981_v21  ;;  %861 = vmatpush3.bf16.msk.msra.mxu1 %vm787_vm11, %v981_v21 }
  0x36   : >> { %826 = vmatprep.subr.msk.bf16.mxu0 %vm789_vm14, %v981_v21  ;;  %854 = vmatprep.subr.msk.bf16.mxu1 %vm789_vm14, %v981_v21 }
  0x39   : >> { %827 = vmatpush3.bf16.msk.msra.mxu0 %vm789_vm14, %v981_v21  ;;  %862 = vmatpush3.bf16.msk.msra.mxu1 %vm789_vm14, %v981_v21 }
  0x3a   : >> { %828 = vmatprep.subr.msk.bf16.mxu0 %vm791_vm1, %v981_v21  ;;  %855 = vmatprep.subr.msk.bf16.mxu1 %vm791_vm1, %v981_v21 }
  0x3d   : >> { %829 = vmatpush3.bf16.msk.msra.mxu0 %vm791_vm1, %v981_v21  ;;  %863 = vmatpush3.bf16.msk.msra.mxu1 %vm791_vm1, %v981_v21 }
  0x3e   : >> { %830 = vmatprep.subr.msk.bf16.mxu0 %vm793_vm4, %v981_v21  ;;  %856 = vmatprep.subr.msk.bf16.mxu1 %vm793_vm4, %v981_v21 }
  0x41   : >> { %831 = vmatpush3.bf16.msk.msra.mxu0 %vm793_vm4, %v981_v21  ;;  %864 = vmatpush3.bf16.msk.msra.mxu1 %vm793_vm4, %v981_v21 }
  0x42   : >> { %832 = vmatprep.subr.msk.bf16.mxu0 %vm795_vm7, %v981_v21  ;;  %857 = vmatprep.subr.msk.bf16.mxu1 %vm795_vm7, %v981_v21 }
  0x45   : >> { %833 = vmatpush3.bf16.msk.msra.mxu0 %vm795_vm7, %v981_v21  ;;  %865 = vmatpush3.bf16.msk.msra.mxu1 %vm795_vm7, %v981_v21 }
  0x48   : >> { %835 = vmatmul.mubr.bf16.vlgmr.msra.gmra.mrb[0].mxu0 %v910_v22  ;;  %843 = vmatmul.mubr.bf16.vlgmr.msra.gmra.mrb[0].mxu1 %v911_v23 }
  0x49   : >> { %838 = vmatprep.mubr.bf16.mxu0 %v912_v24  ;;  %846 = vmatprep.mubr.bf16.mxu1 %v913_v25 }
  0x50   : >> { %839 = vmatmul.mubr.bf16.gmra.mrb[4].mxu0 %v914_v26  ;;  %847 = vmatmul.mubr.bf16.gmra.mrb[4].mxu1 %v915_v27 }
 0x11b   : >> { %v836_v32 = vpop.f32.mrb[0].mxu0  ;;  %v844_v33 = vpop.f32.mrb[0].mxu1 }
 0x11c   : >> { %v495_v36 = vmax.f32 %v479_v28, %v836_v32  ;;  %v503_v37 = vmax.f32 %v487_v29, %v844_v33  ;;  %v414_v38 = vpop.f32.mrb[1].mxu0  ;;  %v446_v39 = vpop.f32.mrb[1].mxu1 }
 0x11d   : >> { %v493_v42 = vmax.f32 %v477_v30, %v414_v38  ;;  %v501_v43 = vmax.f32 %v485_v31, %v446_v39  ;;  %v837_v44 = vpop.f32.mrb[2].mxu0  ;;  %v845_v45 = vpop.f32.mrb[2].mxu1 }
 0x11e   : >> { %511 = vst [vmem:[#allocation2 + $0x10] sm:$0xff] %v495_v36  ;;  %519 = vst [vmem:[#allocation2 + $0x50] sm:$0xff] %v503_v37  ;;  %v496_v46 = vmax.f32 %v480_v34, %v837_v44  ;;  %v504_v47 = vmax.f32 %v488_v35, %v845_v45  ;;  %v417_v48 = vpop.f32.mrb[3].mxu0  ;;  %v449_v49 = vpop.f32.mrb[3].mxu1 }
 0x11f   : >> { %509 = vst [vmem:[#allocation2] sm:$0xff] %v493_v42  ;;  %517 = vst [vmem:[#allocation2 + $0x40] sm:$0xff] %v501_v43  ;;  %v494_v50 = vmax.f32 %v478_v40, %v417_v48  ;;  %v502_v51 = vmax.f32 %v486_v41, %v449_v49 }
 0x120   : >> { %512 = vst [vmem:[#allocation2 + $0x18] sm:$0xff] %v496_v46  ;;  %520 = vst [vmem:[#allocation2 + $0x58] sm:$0xff] %v504_v47 }
 0x121   : >> { %510 = vst [vmem:[#allocation2 + $0x8] sm:$0xff] %v494_v50  ;;  %518 = vst [vmem:[#allocation2 + $0x48] sm:$0xff] %v502_v51 }
 0x123   : >> { %v840_v56 = vpop.f32.mrb[4].mxu0  ;;  %v848_v57 = vpop.f32.mrb[4].mxu1  ;;  %252 = sbr.rel (!%p250_p6) target bundleno = 35 (0x23), region = 80 }
 0x124   : >> { %v499_v60 = vmax.f32 %v483_v52, %v840_v56  ;;  %v507_v61 = vmax.f32 %v491_v53, %v848_v57  ;;  %v430_v62 = vpop.f32.mrb[5].mxu0  ;;  %v462_v63 = vpop.f32.mrb[5].mxu1 }
 0x125   : >> { %v497_v18 = vmax.f32 %v481_v54, %v430_v62  ;;  %v505_v19 = vmax.f32 %v489_v55, %v462_v63  ;;  %v841_v20 = vpop.f32.mrb[6].mxu0  ;;  %v849_v21 = vpop.f32.mrb[6].mxu1 }
 0x126   : >> { %515 = vst [vmem:[#allocation2 + $0x30] sm:$0xff] %v499_v60  ;;  %523 = vst [vmem:[#allocation2 + $0x70] sm:$0xff] %v507_v61  ;;  %v500_v22 = vmax.f32 %v484_v58, %v841_v20  ;;  %v508_v23 = vmax.f32 %v492_v59, %v849_v21  ;;  %v433_v24 = vpop.f32.mrb[7].mxu0  ;;  %v465_v25 = vpop.f32.mrb[7].mxu1 }
 0x127   : >> { %513 = vst [vmem:[#allocation2 + $0x20] sm:$0xff] %v497_v18  ;;  %521 = vst [vmem:[#allocation2 + $0x60] sm:$0xff] %v505_v19  ;;  %v498_v26 = vmax.f32 %v482_v0, %v433_v24  ;;  %v506_v27 = vmax.f32 %v490_v1, %v465_v25 }
 0x128   : >> { %516 = vst [vmem:[#allocation2 + $0x38] sm:$0xff] %v500_v22  ;;  %524 = vst [vmem:[#allocation2 + $0x78] sm:$0xff] %v508_v23 }
 0x129   : >> { %514 = vst [vmem:[#allocation2 + $0x28] sm:$0xff] %v498_v26  ;;  %522 = vst [vmem:[#allocation2 + $0x68] sm:$0xff] %v506_v27 }
 0x12a   : > { %528 = sbr.rel (%p797_p7) target bundleno = 479 (0x1df), region = 51  ;;  %v547_v28 = vld [vmem:[%s1226_s2 + $0x10] sm:$0xff] (!%p797_p7)  ;;  %v545_v29 = vld [vmem:[%s1226_s2] sm:$0xff] (!%p797_p7)  ;;  %v982_v30 = vmov (!%p797_p7), 0   ;;  %v548_v31 = vld [vmem:[%s1226_s2 + $0x18] sm:$0xff] (!%p797_p7)  ;;  %s678_s30 = sld [smem:[#allocation3]] (!%p797_p7) }
 0x12b   : > { %917 = vset.pattern.permute.xlu1 (!%p797_p7), %v982_v30  ;;  %916 = vset.pattern.permute.xlu0 (!%p797_p7), %v982_v30  ;;  %v546_v2 = vld [vmem:[%s1226_s2 + $0x8] sm:$0xff] (!%p797_p7)  ;;  %v549_v4 = vld [vmem:[%s1226_s2 + $0x20] sm:$0xff] (!%p797_p7)  ;;  %v552_v5 = vld [vmem:[%s1226_s2 + $0x38] sm:$0xff] (!%p797_p7) }
 0x12c   : > { %573 = vperm.xlu1 (!%p797_p7), %917, %v547_v28   ;;  %563 = vperm.xlu0 (!%p797_p7), %916, %v545_v29   ;;  %v550_v3 = vld [vmem:[%s1226_s2 + $0x28] sm:$0xff] (!%p797_p7)  ;;  %v551_v6 = vld [vmem:[%s1226_s2 + $0x30] sm:$0xff] (!%p797_p7)  ;;  %v553_v8 = vld [vmem:[%s1226_s2 + $0x40] sm:$0xff] (!%p797_p7) }
 0x12d   : > { %v554_v7 = vld [vmem:[%s1226_s2 + $0x48] sm:$0xff] (!%p797_p7)  ;;  %v556_v9 = vld [vmem:[%s1226_s2 + $0x58] sm:$0xff] (!%p797_p7)  ;;  %v555_v10 = vld [vmem:[%s1226_s2 + $0x50] sm:$0xff] (!%p797_p7) }
 0x12e   : > { %v558_v11 = vld [vmem:[%s1226_s2 + $0x68] sm:$0xff] (!%p797_p7)  ;;  %v557_v12 = vld [vmem:[%s1226_s2 + $0x60] sm:$0xff] (!%p797_p7)  ;;  %v560_v13 = vld [vmem:[%s1226_s2 + $0x78] sm:$0xff] (!%p797_p7) }
 0x12f   : > { %v559_v14 = vld [vmem:[%s1226_s2 + $0x70] sm:$0xff] (!%p797_p7)  ;;  %v529_v17 = vld [vmem:[#allocation2] sm:$0xff] (!%p797_p7)  ;;  %v530_v32 = vld [vmem:[#allocation2 + $0x8] sm:$0xff] (!%p797_p7) }
 0x130   : > { %578 = vperm.xlu1 (!%p797_p7), %917, %v548_v31   ;;  %568 = vperm.xlu0 (!%p797_p7), %916, %v546_v2   ;;  %v531_v33 = vld [vmem:[#allocation2 + $0x10] sm:$0xff] (!%p797_p7)  ;;  %v532_v38 = vld [vmem:[#allocation2 + $0x18] sm:$0xff] (!%p797_p7)  ;;  %v533_v43 = vld [vmem:[#allocation2 + $0x20] sm:$0xff] (!%p797_p7) }
 0x131   : > { %v534_v46 = vld [vmem:[#allocation2 + $0x28] sm:$0xff]  ;;  %v535_v51 = vld [vmem:[#allocation2 + $0x30] sm:$0xff]  ;;  %v536_v54 = vld [vmem:[#allocation2 + $0x38] sm:$0xff] }
 0x132   : > { %v537_v59 = vld [vmem:[#allocation2 + $0x40] sm:$0xff]  ;;  %v538_v62 = vld [vmem:[#allocation2 + $0x48] sm:$0xff]  ;;  %v539_v19 = vld [vmem:[#allocation2 + $0x50] sm:$0xff] }
 0x133   : > { %v540_v22 = vld [vmem:[#allocation2 + $0x58] sm:$0xff]  ;;  %v541_v27 = vld [vmem:[#allocation2 + $0x60] sm:$0xff]  ;;  %v542_v30 = vld [vmem:[#allocation2 + $0x68] sm:$0xff] }
 0x134   : > { %588 = vperm.xlu1 %917, %v550_v3   ;;  %583 = vperm.xlu0 %916, %v549_v4   ;;  %v543_v4 = vld [vmem:[#allocation2 + $0x70] sm:$0xff] }
 0x138   : > { %598 = vperm.xlu1 %917, %v552_v5   ;;  %593 = vperm.xlu0 %916, %v551_v6  }
 0x13c   : > { %608 = vperm.xlu1 %917, %v554_v7   ;;  %603 = vperm.xlu0 %916, %v553_v8   ;;  %v544_v8 = vld [vmem:[#allocation2 + $0x78] sm:$0xff] }
 0x140   : > { %618 = vperm.xlu1 %917, %v556_v9   ;;  %613 = vperm.xlu0 %916, %v555_v10  }
 0x144   : > { %628 = vperm.xlu1 %917, %v558_v11   ;;  %623 = vperm.xlu0 %916, %v557_v12  }
 0x148   : > { %638 = vperm.xlu1 %917, %v560_v13   ;;  %633 = vperm.xlu0 %916, %v559_v14  }
 0x1ab   : > { %v574_v15 = vpop.permute.xlu1 %573  ;;  %v564_v16 = vpop.permute.xlu0 %563 }
 0x1ac   : > { %v641_v36 = vmul.f32 %v564_v16, %v529_v17  ;;  %v643_v39 = vmul.f32 %v574_v15, %v531_v33  ;;  %v679_v33 = vstv %s678_s30 }
 0x1af   : > { %v579_v34 = vpop.permute.xlu1 %578  ;;  %v569_v35 = vpop.permute.xlu0 %568 }
 0x1b0   : > { %v642_v37 = vmul.f32 %v569_v35, %v530_v32  ;;  %v644_v44 = vmul.f32 %v579_v34, %v532_v38 }
 0x1b2   : > { %v657_v40 = vadd.f32 %v642_v37, %v641_v36 }
 0x1b3   : > { %v589_v41 = vpop.permute.xlu1 %588  ;;  %v584_v42 = vpop.permute.xlu0 %583 }
 0x1b4   : > { %v658_v45 = vadd.f32 %v657_v40, %v643_v39  ;;  %v645_v47 = vmul.f32 %v584_v42, %v533_v43  ;;  %v646_v52 = vmul.f32 %v589_v41, %v534_v46 }
 0x1b6   : > { %v659_v48 = vadd.f32 %v658_v45, %v644_v44 }
 0x1b7   : > { %v599_v49 = vpop.permute.xlu1 %598  ;;  %v594_v50 = vpop.permute.xlu0 %593 }
 0x1b8   : > { %v660_v53 = vadd.f32 %v659_v48, %v645_v47  ;;  %v647_v55 = vmul.f32 %v594_v50, %v535_v51  ;;  %v648_v60 = vmul.f32 %v599_v49, %v536_v54 }
 0x1ba   : > { %v661_v56 = vadd.f32 %v660_v53, %v646_v52 }
 0x1bb   : > { %v609_v57 = vpop.permute.xlu1 %608  ;;  %v604_v58 = vpop.permute.xlu0 %603 }
 0x1bc   : > { %v662_v61 = vadd.f32 %v661_v56, %v647_v55  ;;  %v649_v63 = vmul.f32 %v604_v58, %v537_v59  ;;  %v650_v20 = vmul.f32 %v609_v57, %v538_v62 }
 0x1be   : > { %v663_v0 = vadd.f32 %v662_v61, %v648_v60 }
 0x1bf   : > { %v619_v1 = vpop.permute.xlu1 %618  ;;  %v614_v18 = vpop.permute.xlu0 %613 }
 0x1c0   : > { %v664_v21 = vadd.f32 %v663_v0, %v649_v63  ;;  %v651_v23 = vmul.f32 %v614_v18, %v539_v19  ;;  %v652_v28 = vmul.f32 %v619_v1, %v540_v22 }
 0x1c2   : > { %v665_v24 = vadd.f32 %v664_v21, %v650_v20 }
 0x1c3   : > { %v629_v25 = vpop.permute.xlu1 %628  ;;  %v624_v26 = vpop.permute.xlu0 %623 }
 0x1c4   : > { %v666_v29 = vadd.f32 %v665_v24, %v651_v23  ;;  %v653_v31 = vmul.f32 %v624_v26, %v541_v27  ;;  %v654_v5 = vmul.f32 %v629_v25, %v542_v30 }
 0x1c6   : > { %v667_v2 = vadd.f32 %v666_v29, %v652_v28 }
 0x1c7   : > { %v634_v3 = vpop.permute.xlu0 %633  ;;  %v639_v7 = vpop.permute.xlu1 %638 }
 0x1c8   : > { %v668_v6 = vadd.f32 %v667_v2, %v653_v31  ;;  %v655_v9 = vmul.f32 %v634_v3, %v543_v4  ;;  %v656_v11 = vmul.f32 %v639_v7, %v544_v8 }
 0x1ca   : > { %v669_v10 = vadd.f32 %v668_v6, %v654_v5 }
 0x1cc   : > { %v670_v12 = vadd.f32 %v669_v10, %v655_v9 }
 0x1ce   : > { %v671_v13 = vadd.f32 %v670_v12, %v656_v11 }
 0x1d0   : > { %v672_v14 = vrot.slane %v671_v13, 4 }
 0x1d2   : > { %v673_v15 = vadd.f32 %v672_v14, %v671_v13 }
 0x1d4   : > { %v674_v16 = vrot.slane %v673_v15, 2 }
 0x1d6   : > { %v675_v17 = vadd.f32 %v674_v16, %v673_v15 }
 0x1d8   : > { %v676_v32 = vrot.slane %v675_v17, 1 }
 0x1da   : > { %v677_v34 = vadd.f32 %v676_v32, %v675_v17 }
 0x1dc   : > { %v680_v35 = vadd.f32 %v679_v33, %v677_v34 }
 0x1de   : > { %681 = vst [vmem:[#allocation4] sm:$0x1] %v680_v35 }
 0x1df PF: > { %p1189_p8 = scmp.eq.s32.totalorder %s750_s3, 3  ;;  %s983_s6 = smov [#allocation4]  }
 0x1e0   : > { %s691_s7 = sshll.u32 %s983_s6, 4  ;;  %s692_s7 = int_to_ptr.vmem [resolvable:$true] %s691_s7 }
 0x1e1   : > { %s918_s8 = scalar_lea.vmem %s692_s7, 16  ;;  %s924_s9 = scalar_lea.vmem %s692_s7, 32 }
 0x1e2   : > { %p919_p9 = scmp.ne.s32.totalorder %s692_s7, %s918_s8  ;;  %p925_p12 = scmp.lt.s32.totalorder %s692_s7, %s692_s7 }
 0x1e3   : > { %p926_p13 = scmp.lt.s32.totalorder %s924_s9, %s918_s8 }
 0x1e4   : > { %p920_p10 = pnand %p919_p9, %p1189_p8 }
 0x1e5   : > { %p927_p0 = por %p926_p13, %p925_p12 }
 0x1e6   : > { %p921_p11 = pneg %p920_p10 }
 0x1e8   : > { %p928_p1 = pnand %p927_p0, %p921_p11 }
 0x1ea   : > { %931 = shalt.err (!%p928_p1)
}
 0x1eb   : > { %s932_s11 = scalar_lea.hbm %s1228_s4, 16 }
 0x1ec   : > { %p933_p2 = scmp.ne.s32.totalorder %s1228_s4, %s932_s11  ;;  %p938_p5 = scmp.lt.u32.totalorder %s932_s11, %s1228_s4 }
 0x1ee   : > { %p934_p3 = pnand %p933_p2, %p1189_p8 }
 0x1f0   : > { %p935_p4 = pneg %p934_p3 }
 0x1f2   : > { %p940_p6 = pnand %p938_p5, %p935_p4 }
 0x1f4   : > { %943 = shalt.err (!%p940_p6)
}
 0x1f5   : > { %867 = dma.vmem_to_hbm [thread:$0]  (%p1189_p8), %s692_s7, 16, %s1228_s4, [#allocation5]  }
 0x1f6   : > { %961 = dma.done.wait (%p1189_p8), [#allocation5], 16  }
 0x1f7   : > { %963 = vsyncadd (%p1189_p8), [#allocation5], 4294967280 }
 0x1f8 PF: > { %s16_s19 = sadd.s32 1, %s974_s19   ;;  %s1230_s17 = smov %s970_s18 }
 0x1f9   : > { %p13_p7 = scmp.ge.s32.totalorder %s16_s19, 6   ;;  %s1231_s18 = smov %s1233_s20 }
 0x1fb   :  { %15 = sbr.rel (!%p13_p7) target bundleno = 4 (0x4), region = 91 }
 0x202   :  { %704 = vsyncpa [#allocation5], 1 }
 0x203   :  { %706 = vsyncpa [#allocation5 + $0x1], 1 }

</bundles_post_ra>
